<compile_context>
chip_gen: v7x
topology: tpu7x:2x2x1
jax: 0.10.0
libtpu: 0.0.40
codegen_flags: <defaults>
</compile_context>

<pallas_src>
import jax
import jax.numpy as jnp
from jax.experimental import pallas as pl
from jax.experimental.pallas import tpu as pltpu

# Logical (PyTorch) hidden widths and lane-aligned padded widths.
H1, H2 = 300, 400
H1_PAD, H2_PAD = 384, 512
A_PAD = 128            # lane-dense output width
LANE = 128
SUBLANE = 8


def _round_up(n: int, m: int) -> int:
    return ((n + m - 1) // m) * m


def _actor_kernel(x_ref, w1_ref, b1_ref, w2_ref, b2_ref, w3_ref, b3_ref, o_ref):
    # Matmul operands in bf16 (MXU native rate, half the weight bytes);
    # accumulation + all elementwise math stays in f32.
    x = x_ref[...].astype(jnp.bfloat16)                         # (TB, S_pad)

    # Layer 1: Linear(state_dim, 300) + ReLU   (padded to H1_PAD lanes)
    h1 = jnp.dot(x, w1_ref[...], preferred_element_type=jnp.float32)
    h1 = jnp.maximum(h1 + b1_ref[...], 0.0)                     # (TB, 384) f32

    # Layer 2: Linear(300, 400) + ReLU         (padded to H2_PAD lanes)
    h2 = jnp.dot(h1.astype(jnp.bfloat16), w2_ref[...],
                 preferred_element_type=jnp.float32)
    h2 = jnp.maximum(h2 + b2_ref[...], 0.0)                     # (TB, 512) f32

    # Output layer: Linear(400, action_dim) + tanh (padded to A_PAD lanes)
    out = jnp.dot(h2.astype(jnp.bfloat16), w3_ref[...],
                  preferred_element_type=jnp.float32)
    out = jnp.tanh(out + b3_ref[...])                           # (TB, 128) f32

    o_ref[...] = out.astype(o_ref.dtype)


def actor_forward(x, params, *, block_b: int = 256):
    """x: (batch, state_dim) float32. params: padded/bf16 kernel params."""
    w1, b1 = params["w1"], params["b1"]
    w2, b2 = params["w2"], params["b2"]
    w3, b3 = params["w3"], params["b3"]
    action_dim = params["action_dim"]

    batch, state_dim = x.shape
    s_pad = w1.shape[0]

    # Batch tile: multiple of 8 sublanes, capped so per-tile VMEM stays small.
    tb = min(block_b, _round_up(max(batch, 1), SUBLANE))
    b_pad = _round_up(max(batch, 1), tb)

    # Zero-pad the input (extra rows/cols are inert and sliced off afterwards).
    x_pad = jnp.zeros((b_pad, s_pad), jnp.float32).at[:batch, :state_dim].set(x)

    grid = (b_pad // tb,)

    # Weights/biases: full-array blocks, constant index_map -> VMEM-resident
    # across all batch tiles.
    w_spec = lambda a: pl.BlockSpec(a.shape, lambda i: (0, 0))

    out_pad = pl.pallas_call(
        _actor_kernel,
        out_shape=jax.ShapeDtypeStruct((b_pad, A_PAD), jnp.float32),
        grid_spec=pl.GridSpec(
            grid=grid,
            in_specs=[
                pl.BlockSpec((tb, s_pad), lambda i: (i, 0)),    # x: tiled on batch
                w_spec(w1), w_spec(b1),
                w_spec(w2), w_spec(b2),
                w_spec(w3), w_spec(b3),
            ],
            out_specs=pl.BlockSpec((tb, A_PAD), lambda i: (i, 0)),
        ),
        compiler_params=pltpu.CompilerParams(
            dimension_semantics=("parallel",),
            vmem_limit_bytes=32 * 1024 * 1024,
        ),
    )(x_pad, w1, b1, w2, b2, w3, b3)

    # Slice back to the logical shape (drop batch + lane padding).
    return out_pad[:batch, :action_dim]


def init_actor_params(key, state_dim, action_dim):
    """Init matching the PyTorch module, then pad + pre-transpose for the kernel.

    Hidden layers: nn.Linear default init, U(-1/sqrt(fan_in), 1/sqrt(fan_in)).
    Output layer: weight ~ U(-0.003, 0.003), bias = 0.
    Returns (kernel_params, ref_params):
      kernel_params: (in, out) weights zero-padded to lane multiples, bf16;
                     biases zero-padded, f32, shaped (1, out_pad).
      ref_params:    unpadded f32 weights/biases for the pure-JAX reference.
    """
    k1, k2, k3, k4, k5 = jax.random.split(key, 5)

    def linear_default(kw, kb, fan_in, fan_out):
        bound = 1.0 / jnp.sqrt(float(fan_in))
        w = jax.random.uniform(kw, (fan_in, fan_out), jnp.float32, -bound, bound)
        b = jax.random.uniform(kb, (1, fan_out), jnp.float32, -bound, bound)
        return w, b

    w1, b1 = linear_default(k1, k2, state_dim, H1)
    w2, b2 = linear_default(k3, k4, H1, H2)
    w3 = jax.random.uniform(k5, (H2, action_dim), jnp.float32, -0.003, 0.003)
    b3 = jnp.zeros((1, action_dim), jnp.float32)

    s_pad = _round_up(state_dim, LANE)

    def pad2(a, rows, cols):
        return jnp.zeros((rows, cols), a.dtype).at[:a.shape[0], :a.shape[1]].set(a)

    kernel_params = {
        "w1": pad2(w1, s_pad, H1_PAD).astype(jnp.bfloat16),
        "b1": pad2(b1, 1, H1_PAD),
        "w2": pad2(w2, H1_PAD, H2_PAD).astype(jnp.bfloat16),
        "b2": pad2(b2, 1, H2_PAD),
        "w3": pad2(w3, H2_PAD, A_PAD).astype(jnp.bfloat16),
        "b3": pad2(b3, 1, A_PAD),
        "state_dim": state_dim,
        "action_dim": action_dim,
    }
    ref_params = {"w1": w1, "b1": b1, "w2": w2, "b2": b2, "w3": w3, "b3": b3}
    return kernel_params, ref_params


def actor_ref(x, p):
    """Pure-JAX f32 reference for correctness checking (unpadded weights)."""
    h1 = jnp.maximum(x @ p["w1"] + p["b1"], 0.0)
    h2 = jnp.maximum(h1 @ p["w2"] + p["b2"], 0.0)
    return jnp.tanh(h2 @ p["w3"] + p["b3"])


if __name__ == "__main__":
    key = jax.random.PRNGKey(0)
    k_param, k_input = jax.random.split(key)

    batch, state_dim, action_dim = 2, 16, 4
    params, ref_params = init_actor_params(k_param, state_dim, action_dim)
    x = jax.random.normal(k_input, (batch, state_dim), jnp.float32)

    out = actor_forward(x, params)
    out = jax.block_until_ready(out)

    ref = actor_ref(x, ref_params)
    assert out.shape == (batch, action_dim)
    # bf16 matmul operands => small rounding vs the f32 reference.
    assert jnp.allclose(out, ref, atol=1e-2, rtol=1e-2), float(
        jnp.max(jnp.abs(out - ref)))

    print("KERNEL_OK")
</pallas_src>

<mosaic_0001>
module attributes {stable_mosaic.version = 11 : i64} {
  func.func @_actor_kernel(%arg0: i32, %arg1: memref<8x128xf32, #tpu.memory_space<vmem>>, %arg2: memref<128x384xbf16, #tpu.memory_space<vmem>>, %arg3: memref<1x384xf32, #tpu.memory_space<vmem>>, %arg4: memref<384x512xbf16, #tpu.memory_space<vmem>>, %arg5: memref<1x512xf32, #tpu.memory_space<vmem>>, %arg6: memref<512x128xbf16, #tpu.memory_space<vmem>>, %arg7: memref<1x128xf32, #tpu.memory_space<vmem>>, %arg8: memref<8x128xf32, #tpu.memory_space<vmem>>) attributes {dimension_semantics = [#tpu.dimension_semantics<parallel>], iteration_bounds = array<i64: 1>, scalar_prefetch = 0 : i64, scratch_operands = 0 : i64, tpu.core_type = #tpu.core_type<tc>, window_params = [{transform_indices = @transform_0, window_bounds = array<i64: 8, 128>}, {pipeline_mode = #tpu.pipeline_mode<synchronous>, transform_indices = @transform_1, window_bounds = array<i64: 128, 384>}, {pipeline_mode = #tpu.pipeline_mode<synchronous>, transform_indices = @transform_2, window_bounds = array<i64: 1, 384>}, {pipeline_mode = #tpu.pipeline_mode<synchronous>, transform_indices = @transform_3, window_bounds = array<i64: 384, 512>}, {pipeline_mode = #tpu.pipeline_mode<synchronous>, transform_indices = @transform_4, window_bounds = array<i64: 1, 512>}, {pipeline_mode = #tpu.pipeline_mode<synchronous>, transform_indices = @transform_5, window_bounds = array<i64: 512, 128>}, {pipeline_mode = #tpu.pipeline_mode<synchronous>, transform_indices = @transform_6, window_bounds = array<i64: 1, 128>}, {transform_indices = @transform_7, window_bounds = array<i64: 8, 128>}]} {
    %c0 = arith.constant 0 : index
    %c0_0 = arith.constant 0 : index
    %0 = vector.load %arg1[%c0, %c0_0] : memref<8x128xf32, #tpu.memory_space<vmem>>, vector<8x128xf32>
    %1 = arith.truncf %0 : vector<8x128xf32> to vector<8x128xbf16>
    %c0_1 = arith.constant 0 : index
    %c0_2 = arith.constant 0 : index
    %2 = vector.load %arg2[%c0_1, %c0_2] : memref<128x384xbf16, #tpu.memory_space<vmem>>, vector<128x384xbf16>
    %cst = arith.constant dense<0.000000e+00> : vector<8x384xf32>
    %3 = tpu.matmul %1, %2, %cst {dimension_numbers = #tpu.dot_dimension_numbers<[1], [0], [0], [1], [0, 0, 1, 1], [], []>} : vector<8x128xbf16>, vector<128x384xbf16>, vector<8x384xf32> -> vector<8x384xf32>
    %c0_3 = arith.constant 0 : index
    %c0_4 = arith.constant 0 : index
    %4 = vector.load %arg3[%c0_3, %c0_4] : memref<1x384xf32, #tpu.memory_space<vmem>>, vector<1x384xf32>
    %5 = vector.broadcast %4 : vector<1x384xf32> to vector<8x384xf32>
    %6 = arith.addf %3, %5 : vector<8x384xf32>
    %cst_5 = arith.constant 0.000000e+00 : f32
    %7 = vector.broadcast %cst_5 : f32 to vector<8x384xf32>
    %8 = arith.maximumf %6, %7 : vector<8x384xf32>
    %9 = arith.truncf %8 : vector<8x384xf32> to vector<8x384xbf16>
    %c0_6 = arith.constant 0 : index
    %c0_7 = arith.constant 0 : index
    %10 = vector.load %arg4[%c0_6, %c0_7] : memref<384x512xbf16, #tpu.memory_space<vmem>>, vector<384x512xbf16>
    %cst_8 = arith.constant dense<0.000000e+00> : vector<8x512xf32>
    %11 = tpu.matmul %9, %10, %cst_8 {dimension_numbers = #tpu.dot_dimension_numbers<[1], [0], [0], [1], [0, 0, 1, 1], [], []>} : vector<8x384xbf16>, vector<384x512xbf16>, vector<8x512xf32> -> vector<8x512xf32>
    %c0_9 = arith.constant 0 : index
    %c0_10 = arith.constant 0 : index
    %12 = vector.load %arg5[%c0_9, %c0_10] : memref<1x512xf32, #tpu.memory_space<vmem>>, vector<1x512xf32>
    %13 = vector.broadcast %12 : vector<1x512xf32> to vector<8x512xf32>
    %14 = arith.addf %11, %13 : vector<8x512xf32>
    %cst_11 = arith.constant 0.000000e+00 : f32
    %15 = vector.broadcast %cst_11 : f32 to vector<8x512xf32>
    %16 = arith.maximumf %14, %15 : vector<8x512xf32>
    %17 = arith.truncf %16 : vector<8x512xf32> to vector<8x512xbf16>
    %c0_12 = arith.constant 0 : index
    %c0_13 = arith.constant 0 : index
    %18 = vector.load %arg6[%c0_12, %c0_13] : memref<512x128xbf16, #tpu.memory_space<vmem>>, vector<512x128xbf16>
    %cst_14 = arith.constant dense<0.000000e+00> : vector<8x128xf32>
    %19 = tpu.matmul %17, %18, %cst_14 {dimension_numbers = #tpu.dot_dimension_numbers<[1], [0], [0], [1], [0, 0, 1, 1], [], []>} : vector<8x512xbf16>, vector<512x128xbf16>, vector<8x128xf32> -> vector<8x128xf32>
    %c0_15 = arith.constant 0 : index
    %c0_16 = arith.constant 0 : index
    %20 = vector.load %arg7[%c0_15, %c0_16] : memref<1x128xf32, #tpu.memory_space<vmem>>, vector<1x128xf32>
    %21 = vector.broadcast %20 : vector<1x128xf32> to vector<8x128xf32>
    %22 = arith.addf %19, %21 : vector<8x128xf32>
    %23 = math.tanh %22 : vector<8x128xf32>
    %c0_17 = arith.constant 0 : index
    %c0_18 = arith.constant 0 : index
    %24 = vector.load %arg8[%c0_17, %c0_18] : memref<8x128xf32, #tpu.memory_space<vmem>>, vector<8x128xf32>
    tpu.vector_store %arg8[%c0_17, %c0_18], %23 {strides = array<i32>} : memref<8x128xf32, #tpu.memory_space<vmem>>, vector<8x128xf32>,
    return
  }
  func.func @transform_0(%arg0: i32) -> (i32, i32) {
    %c0_i32 = arith.constant 0 : i32
    %c0_i32_0 = arith.constant 0 : i32
    return %arg0, %c0_i32 : i32, i32
  }
  func.func @transform_1(%arg0: i32) -> (i32, i32) {
    %c0_i32 = arith.constant 0 : i32
    %c0_i32_0 = arith.constant 0 : i32
    %c0_i32_1 = arith.constant 0 : i32
    return %c0_i32, %c0_i32_0 : i32, i32
  }
  func.func @transform_2(%arg0: i32) -> (i32, i32) {
    %c0_i32 = arith.constant 0 : i32
    %c0_i32_0 = arith.constant 0 : i32
    %c0_i32_1 = arith.constant 0 : i32
    return %c0_i32, %c0_i32_0 : i32, i32
  }
  func.func @transform_3(%arg0: i32) -> (i32, i32) {
    %c0_i32 = arith.constant 0 : i32
    %c0_i32_0 = arith.constant 0 : i32
    %c0_i32_1 = arith.constant 0 : i32
    return %c0_i32, %c0_i32_0 : i32, i32
  }
  func.func @transform_4(%arg0: i32) -> (i32, i32) {
    %c0_i32 = arith.constant 0 : i32
    %c0_i32_0 = arith.constant 0 : i32
    %c0_i32_1 = arith.constant 0 : i32
    return %c0_i32, %c0_i32_0 : i32, i32
  }
  func.func @transform_5(%arg0: i32) -> (i32, i32) {
    %c0_i32 = arith.constant 0 : i32
    %c0_i32_0 = arith.constant 0 : i32
    %c0_i32_1 = arith.constant 0 : i32
    return %c0_i32, %c0_i32_0 : i32, i32
  }
  func.func @transform_6(%arg0: i32) -> (i32, i32) {
    %c0_i32 = arith.constant 0 : i32
    %c0_i32_0 = arith.constant 0 : i32
    %c0_i32_1 = arith.constant 0 : i32
    return %c0_i32, %c0_i32_0 : i32, i32
  }
  func.func @transform_7(%arg0: i32) -> (i32, i32) {
    %c0_i32 = arith.constant 0 : i32
    %c0_i32_0 = arith.constant 0 : i32
    return %arg0, %c0_i32 : i32, i32
  }
}

</mosaic_0001>

<bundles_post_ra>
// kernel: tpu_custom_call.1
= control target key start
LH: loop header
LB: loop body
LE: loop exit
PB: predicated region body
PF: predicated region fallthrough
CT: control target
= control target key end

     0   :  { %12 = vsyncpa [#allocation3], 0  ;;  %s2212_s0 = inlined_call_operand.hbm [shape: f32[8,128], index: 0, kind: input, shape index: {}]   ;;  %s2213_s1 = inlined_call_operand.hbm [shape: bf16[128,384], index: 1, kind: input, shape index: {}]   ;;  %s2214_s2 = inlined_call_operand.vmem [shape: f32[1,384], index: 2, kind: input, shape index: {}]   ;;  %s2215_s3 = inlined_call_operand.hbm [shape: bf16[384,512], index: 3, kind: input, shape index: {}]   ;;  %s2216_s4 = inlined_call_operand.vmem [shape: f32[1,512], index: 4, kind: input, shape index: {}]   ;;  %s2217_s5 = inlined_call_operand.hbm [shape: bf16[512,128], index: 5, kind: input, shape index: {}]   ;;  %s2218_s6 = inlined_call_operand.vmem [shape: f32[1,128], index: 6, kind: input, shape index: {}]   ;;  %s2219_s7 = inlined_call_operand.hbm [shape: f32[8,128], index: 7, kind: output, shape index: {}]  }
   0x1   :  { %13 = vsyncpa [#allocation6], 0 }
   0x2   :  { %14 = vsyncpa [#allocation9], 0 }
   0x3   :  { %15 = vsyncpa [#allocation4], 0  ;;  %s2059_s24 = smov [#allocation5]   ;;  %s1941_s28 = scalar_lea.hbm %s2213_s1, 3072 }
   0x4   :  { %s31_s25 = sshll.u32 %s2059_s24, 4  ;;  %p1942_p0 = scmp.ne.s32.totalorder %s2213_s1, %s1941_s28  ;;  %s32_s25 = int_to_ptr.vmem [resolvable:$true] %s31_s25 }
   0x5   :  { %p1945_p1 = scmp.lt.u32.totalorder %s1941_s28, %s2213_s1 }
   0x7   :  { %p1947_p2 = pnand %p1945_p1, %p1942_p0 }
   0x9   :  { %1950 = shalt.err (!%p1947_p2)
}
   0xa   :  { %s1951_s10 = scalar_lea.vmem %s32_s25, 3072  ;;  %p1956_p4 = scmp.lt.s32.totalorder %s32_s25, %s32_s25 }
   0xb   :  { %p1952_p3 = scmp.ne.s32.totalorder %s32_s25, %s1951_s10  ;;  %p1957_p5 = scmp.lt.s32.totalorder %s1951_s10, %s1951_s10 }
   0xd   :  { %p1958_p6 = por %p1957_p5, %p1956_p4 }
   0xf   :  { %p1959_p7 = pnand %p1958_p6, %p1952_p3 }
  0x11   :  { %1962 = shalt.err (!%p1959_p7)
}
  0x12   :  { %s2060_s11 = smov 192   ;;  %s2061_s12 = smov 12  }
  0x13   :  { %37 = dma.hbm_to_vmem [thread:$0]  %s2213_s1, 3072, %s32_s25, [#allocation6], %s2060_s11, %s2060_s11, %s2061_s12  }
  0x14   :  { %s2062_s15 = smov [#allocation2]   ;;  %s2063_s17 = smov [#allocation7]  }
  0x15   :  { %s22_s16 = sshll.u32 %s2062_s15, 4  ;;  %s45_s18 = sshll.u32 %s2063_s17, 4  ;;  %s23_s16 = int_to_ptr.vmem [resolvable:$true] %s22_s16  ;;  %s46_s18 = int_to_ptr.vmem [resolvable:$true] %s45_s18 }
  0x16   :  { %s1963_s21 = scalar_lea.hbm %s2212_s0, 128 }
  0x17   :  { %p1964_p8 = scmp.ne.s32.totalorder %s2212_s0, %s1963_s21  ;;  %p1967_p9 = scmp.lt.u32.totalorder %s1963_s21, %s2212_s0 }
  0x19   :  { %p1969_p10 = pnand %p1967_p9, %p1964_p8 }
  0x1b   :  { %1972 = shalt.err (!%p1969_p10)
}
  0x1c   :  { %s1973_s1 = scalar_lea.vmem %s23_s16, 128  ;;  %p1978_p12 = scmp.lt.s32.totalorder %s23_s16, %s23_s16 }
  0x1d   :  { %p1974_p11 = scmp.ne.s32.totalorder %s23_s16, %s1973_s1  ;;  %p1979_p13 = scmp.lt.s32.totalorder %s1973_s1, %s1973_s1 }
  0x1f   :  { %p1980_p0 = por %p1979_p13, %p1978_p12 }
  0x21   :  { %p1981_p1 = pnand %p1980_p0, %p1974_p11 }
  0x23   :  { %1984 = shalt.err (!%p1981_p1)
}
  0x24   :  { %25 = dma.hbm_to_vmem [thread:$0]  %s2212_s0, 128, %s23_s16, [#allocation3]  }
  0x25   :  { %s1985_s30 = scalar_lea.hbm %s2215_s3, 12288 }
  0x26   :  { %p1986_p2 = scmp.ne.s32.totalorder %s2215_s3, %s1985_s30  ;;  %p1989_p3 = scmp.lt.u32.totalorder %s1985_s30, %s2215_s3 }
  0x28   :  { %p1991_p4 = pnand %p1989_p3, %p1986_p2 }
  0x2a   :  { %1994 = shalt.err (!%p1991_p4)
}
  0x2b   :  { %s1995_s12 = scalar_lea.vmem %s46_s18, 12288  ;;  %p2000_p6 = scmp.lt.s32.totalorder %s46_s18, %s46_s18 }
  0x2c   :  { %p1996_p5 = scmp.ne.s32.totalorder %s46_s18, %s1995_s12  ;;  %p2001_p7 = scmp.lt.s32.totalorder %s1995_s12, %s1995_s12 }
  0x2e   :  { %p2002_p8 = por %p2001_p7, %p2000_p6 }
  0x30   :  { %p2003_p9 = pnand %p2002_p8, %p1996_p5 }
  0x32   :  { %2006 = shalt.err (!%p2003_p9)
}
  0x33   :  { %s2064_s0 = smov 256   ;;  %s2065_s13 = smov 16  }
  0x34   :  { %51 = dma.hbm_to_vmem [thread:$0]  %s2215_s3, 12288, %s46_s18, [#allocation6], %s2064_s0, %s2064_s0, %s2065_s13  }
  0x35   :  { %s2066_s16 = smov [#allocation8]   ;;  %s2007_s21 = scalar_lea.hbm %s2217_s5, 4096 }
  0x36   :  { %s59_s17 = sshll.u32 %s2066_s16, 4  ;;  %p2008_p10 = scmp.ne.s32.totalorder %s2217_s5, %s2007_s21  ;;  %s60_s17 = int_to_ptr.vmem [resolvable:$true] %s59_s17 }
  0x37   :  { %p2011_p11 = scmp.lt.u32.totalorder %s2007_s21, %s2217_s5 }
  0x39   :  { %p2013_p12 = pnand %p2011_p11, %p2008_p10 }
  0x3b   :  { %2016 = shalt.err (!%p2013_p12)
}
  0x3c   :  { %s2017_s1 = scalar_lea.vmem %s60_s17, 4096  ;;  %p2022_p0 = scmp.lt.s32.totalorder %s60_s17, %s60_s17 }
  0x3d   :  { %p2018_p13 = scmp.ne.s32.totalorder %s60_s17, %s2017_s1  ;;  %p2023_p1 = scmp.lt.s32.totalorder %s2017_s1, %s2017_s1 }
  0x3f   :  { %p2024_p2 = por %p2023_p1, %p2022_p0 }
  0x41   :  { %p2025_p3 = pnand %p2024_p2, %p2018_p13 }
  0x43   :  { %2028 = shalt.err (!%p2025_p3)
}
  0x44   :  { %s2067_s3 = smov 64   ;;  %s2068_s18 = smov 4  }
  0x45   :  { %65 = dma.hbm_to_vmem [thread:$0]  %s2217_s5, 4096, %s60_s17, [#allocation9], %s2067_s3, %s2067_s3, %s2068_s18  }
  0x46   :  { %2051 = dma.done.wait [#allocation3], 128  }
  0x47   :  { %2052 = vsyncadd [#allocation3], 4294967168 }
  0x48   :  { %2053 = dma.done.wait [#allocation6], 15360  }
  0x49   :  { %2054 = vsyncadd [#allocation6], 4294951936 }
  0x4a   :  { %2055 = dma.done.wait [#allocation9], 4096  }
  0x4b   :  { %2056 = vsyncadd [#allocation9], 4294963200  ;;  %v2069_v0 = vmov 0.0   ;;  %v2070_v1 = vmov 0   ;;  %vm2071_vm0 = vmmov 0   ;;  %v81_v23 = vld [vmem:[#allocation2] sm:$0xff] }
  0x4c   :  { %1685 = vmatprep.subr.bf16.mxu1 %v2069_v0  ;;  %292 = vmatprep.mubr.bf16.mxu0 %v2070_v1  ;;  %v1731_v2 = vld [vmem:[#allocation5 + $0x4] ss:$12 sps:$4 sm:$0xff]   ;;  %v1733_v3 = vld [vmem:[#allocation5] ss:$12 sps:$4 sm:$0xff]   ;;  %v1734_v4 = vld [vmem:[#allocation5 + $0x1c] ss:$12 sps:$4 sm:$0xff]   ;;  %v82_v26 = vpack.c.bf16 %v81_v23, %v81_v23 }
  0x4d   :  { %1701 = vmatprep.mubr.msk.bf16.mxu1 %vm2071_vm0, %v2069_v0  ;;  %260 = vmatprep.subr.bf16.mxu0 %v1731_v2  ;;  %v1736_v5 = vld [vmem:[#allocation5 + $0x18] ss:$12 sps:$4 sm:$0xff]   ;;  %v1737_v6 = vld [vmem:[#allocation5 + $0x34] ss:$12 sps:$4 sm:$0xff]   ;;  %v1739_v7 = vld [vmem:[#allocation5 + $0x30] ss:$12 sps:$4 sm:$0xff]  }
  0x4e   :  { %261 = vmatpush1.bf16.msra.mxu0 %v1733_v3  ;;  %v1740_v8 = vld [vmem:[#allocation5 + $0x4c] ss:$12 sps:$4 sm:$0xff]   ;;  %v1742_v9 = vld [vmem:[#allocation5 + $0x48] ss:$12 sps:$4 sm:$0xff]   ;;  %v1743_v11 = vld [vmem:[#allocation5 + $0x64] ss:$12 sps:$4 sm:$0xff]  }
  0x4f   :  { %262 = vmatprep.subr.bf16.mxu0 %v1734_v4  ;;  %v1755_v10 = vld [vmem:[#allocation5 + $0x8] ss:$12 sps:$4 sm:$0xff]   ;;  %v1756_v12 = vld [vmem:[#allocation5 + $0x20] ss:$12 sps:$4 sm:$0xff]   ;;  %v1757_v15 = vld [vmem:[#allocation5 + $0x38] ss:$12 sps:$4 sm:$0xff]  }
  0x50   :  { %1686 = vmatpush3.bf16.msra.mxu1 %v1755_v10  ;;  %v1745_v13 = vld [vmem:[#allocation5 + $0x60] ss:$12 sps:$4 sm:$0xff]   ;;  %v1746_v14 = vld [vmem:[#allocation5 + $0x7c] ss:$12 sps:$4 sm:$0xff]   ;;  %v1748_v16 = vld [vmem:[#allocation5 + $0x78] ss:$12 sps:$4 sm:$0xff]  }
  0x51   :  { %1687 = vmatprep.subr.bf16.mxu1 %v2069_v0  ;;  %v1749_v17 = vld [vmem:[#allocation5 + $0x94] ss:$12 sps:$4 sm:$0xff]   ;;  %v1758_v18 = vld [vmem:[#allocation5 + $0x50] ss:$12 sps:$4 sm:$0xff]   ;;  %v1752_v20 = vld [vmem:[#allocation5 + $0xac] ss:$12 sps:$4 sm:$0xff]  }
  0x52   :  { %263 = vmatpush1.bf16.msra.mxu0 %v1736_v5  ;;  %v1751_v19 = vld [vmem:[#allocation5 + $0x90] ss:$12 sps:$4 sm:$0xff]   ;;  %v1759_v21 = vld [vmem:[#allocation5 + $0x68] ss:$12 sps:$4 sm:$0xff]   ;;  %v1760_v25 = vld [vmem:[#allocation5 + $0x80] ss:$12 sps:$4 sm:$0xff]  }
  0x53   :  { %264 = vmatprep.subr.bf16.mxu0 %v1737_v6  ;;  %v1754_v22 = vld [vmem:[#allocation5 + $0xa8] ss:$12 sps:$4 sm:$0xff]   ;;  %v1763_v27 = vld [vmem:[#allocation7] ss:$16 sps:$4 sm:$0xff]   ;;  %v1761_v29 = vld [vmem:[#allocation5 + $0x98] ss:$12 sps:$4 sm:$0xff]  }
  0x54   :  { %1688 = vmatpush3.bf16.msra.mxu1 %v1756_v12  ;;  %v1765_v24 = vld [vmem:[#allocation7 + $0x4] ss:$16 sps:$4 sm:$0xff]   ;;  %v1769_v30 = vld [vmem:[#allocation7 + $0x20] ss:$16 sps:$4 sm:$0xff]   ;;  %v1768_v33 = vld [vmem:[#allocation7 + $0xc] ss:$16 sps:$4 sm:$0xff]  }
  0x55   :  { %1689 = vmatprep.subr.bf16.mxu1 %v2069_v0  ;;  %v1771_v28 = vld [vmem:[#allocation7 + $0x24] ss:$16 sps:$4 sm:$0xff]   ;;  %v1762_v32 = vld [vmem:[#allocation5 + $0xb0] ss:$12 sps:$4 sm:$0xff]   ;;  %v1766_v36 = vld [vmem:[#allocation7 + $0x8] ss:$16 sps:$4 sm:$0xff]  }
  0x56   :  { %265 = vmatpush1.bf16.msra.mxu0 %v1739_v7  ;;  %v1777_v31 = vld [vmem:[#allocation7 + $0x44] ss:$16 sps:$4 sm:$0xff]   ;;  %v1775_v34 = vld [vmem:[#allocation7 + $0x40] ss:$16 sps:$4 sm:$0xff]   ;;  %v1774_v37 = vld [vmem:[#allocation7 + $0x2c] ss:$16 sps:$4 sm:$0xff]  }
  0x57   :  { %266 = vmatprep.subr.bf16.mxu0 %v1740_v8  ;;  %v1783_v35 = vld [vmem:[#allocation7 + $0x64] ss:$16 sps:$4 sm:$0xff]   ;;  %v1781_v38 = vld [vmem:[#allocation7 + $0x60] ss:$16 sps:$4 sm:$0xff]   ;;  %v1772_v40 = vld [vmem:[#allocation7 + $0x28] ss:$16 sps:$4 sm:$0xff]  }
  0x58   :  { %1690 = vmatpush3.bf16.msra.mxu1 %v1757_v15  ;;  %v1789_v39 = vld [vmem:[#allocation7 + $0x84] ss:$16 sps:$4 sm:$0xff]   ;;  %v1780_v41 = vld [vmem:[#allocation7 + $0x4c] ss:$16 sps:$4 sm:$0xff]   ;;  %v1787_v42 = vld [vmem:[#allocation7 + $0x80] ss:$16 sps:$4 sm:$0xff]  }
  0x59   :  { %1691 = vmatprep.subr.bf16.mxu1 %v2069_v0  ;;  %v1795_v43 = vld [vmem:[#allocation7 + $0xa4] ss:$16 sps:$4 sm:$0xff]   ;;  %v1778_v44 = vld [vmem:[#allocation7 + $0x48] ss:$16 sps:$4 sm:$0xff]   ;;  %v1786_v45 = vld [vmem:[#allocation7 + $0x6c] ss:$16 sps:$4 sm:$0xff]  }
  0x5a   :  { %267 = vmatpush1.bf16.msra.mxu0 %v1742_v9  ;;  %v1793_v46 = vld [vmem:[#allocation7 + $0xa0] ss:$16 sps:$4 sm:$0xff]   ;;  %v1801_v47 = vld [vmem:[#allocation7 + $0xc4] ss:$16 sps:$4 sm:$0xff]   ;;  %v1784_v48 = vld [vmem:[#allocation7 + $0x68] ss:$16 sps:$4 sm:$0xff]  }
  0x5b   :  { %268 = vmatprep.subr.bf16.mxu0 %v1743_v11  ;;  %v1792_v49 = vld [vmem:[#allocation7 + $0x8c] ss:$16 sps:$4 sm:$0xff]   ;;  %v1790_v50 = vld [vmem:[#allocation7 + $0x88] ss:$16 sps:$4 sm:$0xff]   ;;  %v1799_v51 = vld [vmem:[#allocation7 + $0xc0] ss:$16 sps:$4 sm:$0xff]  }
  0x5c   :  { %1692 = vmatpush3.bf16.msra.mxu1 %v1758_v18  ;;  %v1798_v52 = vld [vmem:[#allocation7 + $0xac] ss:$16 sps:$4 sm:$0xff]   ;;  %v1807_v53 = vld [vmem:[#allocation7 + $0xe4] ss:$16 sps:$4 sm:$0xff]   ;;  %v1805_v54 = vld [vmem:[#allocation7 + $0xe0] ss:$16 sps:$4 sm:$0xff]  }
  0x5d   :  { %1693 = vmatprep.subr.bf16.mxu1 %v2069_v0  ;;  %v1813_v55 = vld [vmem:[#allocation7 + $0x104] ss:$16 sps:$4 sm:$0xff]   ;;  %v1796_v56 = vld [vmem:[#allocation7 + $0xa8] ss:$16 sps:$4 sm:$0xff]   ;;  %v1804_v57 = vld [vmem:[#allocation7 + $0xcc] ss:$16 sps:$4 sm:$0xff]  }
  0x5e   :  { %269 = vmatpush1.bf16.msra.mxu0 %v1745_v13  ;;  %v1811_v58 = vld [vmem:[#allocation7 + $0x100] ss:$16 sps:$4 sm:$0xff]   ;;  %v1819_v59 = vld [vmem:[#allocation7 + $0x124] ss:$16 sps:$4 sm:$0xff]   ;;  %v1802_v60 = vld [vmem:[#allocation7 + $0xc8] ss:$16 sps:$4 sm:$0xff]  }
  0x5f   :  { %270 = vmatprep.subr.bf16.mxu0 %v1746_v14  ;;  %v1810_v61 = vld [vmem:[#allocation7 + $0xec] ss:$16 sps:$4 sm:$0xff]   ;;  %v1817_v62 = vld [vmem:[#allocation7 + $0x120] ss:$16 sps:$4 sm:$0xff]   ;;  %v1825_v63 = vld [vmem:[#allocation7 + $0x144] ss:$16 sps:$4 sm:$0xff]  }
  0x60   :  { %1694 = vmatpush3.bf16.msra.mxu1 %v1759_v21  ;;  %v1816_v2 = vld [vmem:[#allocation7 + $0x10c] ss:$16 sps:$4 sm:$0xff]   ;;  %v1823_v3 = vld [vmem:[#allocation7 + $0x140] ss:$16 sps:$4 sm:$0xff]   ;;  %v1831_v4 = vld [vmem:[#allocation7 + $0x164] ss:$16 sps:$4 sm:$0xff]  }
  0x61   :  { %1695 = vmatprep.subr.bf16.mxu1 %v2069_v0  ;;  %v1814_v5 = vld [vmem:[#allocation7 + $0x108] ss:$16 sps:$4 sm:$0xff]   ;;  %v1822_v6 = vld [vmem:[#allocation7 + $0x12c] ss:$16 sps:$4 sm:$0xff]   ;;  %v1829_v7 = vld [vmem:[#allocation7 + $0x160] ss:$16 sps:$4 sm:$0xff]  }
  0x62   :  { %271 = vmatpush1.bf16.msra.mxu0 %v1748_v16  ;;  %v1837_v8 = vld [vmem:[#allocation7 + $0x184] ss:$16 sps:$4 sm:$0xff]   ;;  %v1820_v9 = vld [vmem:[#allocation7 + $0x128] ss:$16 sps:$4 sm:$0xff]   ;;  %v1828_v10 = vld [vmem:[#allocation7 + $0x14c] ss:$16 sps:$4 sm:$0xff]  }
  0x63   :  { %272 = vmatprep.subr.bf16.mxu0 %v1749_v17  ;;  %v1835_v11 = vld [vmem:[#allocation7 + $0x180] ss:$16 sps:$4 sm:$0xff]   ;;  %v1843_v12 = vld [vmem:[#allocation7 + $0x1a4] ss:$16 sps:$4 sm:$0xff]   ;;  %v1826_v13 = vld [vmem:[#allocation7 + $0x148] ss:$16 sps:$4 sm:$0xff]  }
  0x64   :  { %1696 = vmatpush3.bf16.msra.mxu1 %v1760_v25  ;;  %v1834_v14 = vld [vmem:[#allocation7 + $0x16c] ss:$16 sps:$4 sm:$0xff]   ;;  %v1841_v15 = vld [vmem:[#allocation7 + $0x1a0] ss:$16 sps:$4 sm:$0xff]   ;;  %v1832_v16 = vld [vmem:[#allocation7 + $0x168] ss:$16 sps:$4 sm:$0xff]  }
  0x65   :  { %1697 = vmatprep.subr.bf16.mxu1 %v2069_v0  ;;  %v1840_v17 = vld [vmem:[#allocation7 + $0x18c] ss:$16 sps:$4 sm:$0xff]   ;;  %v1838_v18 = vld [vmem:[#allocation7 + $0x188] ss:$16 sps:$4 sm:$0xff]   ;;  %v1849_v21 = vld [vmem:[#allocation7 + $0x1c4] ss:$16 sps:$4 sm:$0xff]  }
  0x66   :  { %273 = vmatpush1.bf16.msra.mxu0 %v1751_v19  ;;  %v1846_v19 = vld [vmem:[#allocation7 + $0x1ac] ss:$16 sps:$4 sm:$0xff]   ;;  %v1847_v23 = vld [vmem:[#allocation7 + $0x1c0] ss:$16 sps:$4 sm:$0xff]   ;;  %v1855_v25 = vld [vmem:[#allocation7 + $0x1e4] ss:$16 sps:$4 sm:$0xff]  }
  0x67   :  { %274 = vmatprep.subr.bf16.mxu0 %v1752_v20  ;;  %v1844_v20 = vld [vmem:[#allocation7 + $0x1a8] ss:$16 sps:$4 sm:$0xff]   ;;  %s2072_s8 = smov [#allocation10]  }
  0x68   :  { %1698 = vmatpush3.bf16.msra.mxu1 %v1761_v29  ;;  %v1861_v29 = vld [vmem:[#allocation7 + $0x204] ss:$16 sps:$4 sm:$0xff]   ;;  %s1468_s9 = sshll.u32 %s2072_s8, 4  ;;  %s1469_s9 = int_to_ptr.vmem [resolvable:$true] %s1468_s9 }
  0x69   :  { %1699 = vmatprep.subr.bf16.mxu1 %v2069_v0  ;;  %v1808_v0 = vld [vmem:[#allocation7 + $0xe8] ss:$16 sps:$4 sm:$0xff]   ;;  %s2029_s10 = scalar_lea.vmem %s1469_s9, 128  ;;  %p2034_p5 = scmp.lt.s32.totalorder %s1469_s9, %s1469_s9 }
  0x6a   :  { %275 = vmatpush1.bf16.msra.mxu0 %v1754_v22  ;;  %v1852_v22 = vld [vmem:[#allocation7 + $0x1cc] ss:$16 sps:$4 sm:$0xff]   ;;  %p2030_p4 = scmp.ne.s32.totalorder %s1469_s9, %s2029_s10  ;;  %p2035_p6 = scmp.lt.s32.totalorder %s2029_s10, %s2029_s10 }
  0x6b   :  { %945 = vmatprep.subr.bf16.mxu0 %v1765_v24  ;;  %v1850_v24 = vld [vmem:[#allocation7 + $0x1c8] ss:$16 sps:$4 sm:$0xff]  }
  0x6c   :  { %1700 = vmatpush3.bf16.msra.mxu1 %v1762_v32  ;;  %p2036_p7 = por %p2035_p6, %p2034_p5 }
  0x6d   :  { %293 = vmatmul.mubr.bf16.vlgmr.msra.gmra.mrb[0].mxu0 %v82_v26  ;;  %1027 = vmatprep.subr.bf16.mxu1 %v1768_v33 }
  0x6e   :  { %946 = vmatpush1.bf16.msra.mxu0 %v1763_v27  ;;  %v1853_v27 = vld [vmem:[#allocation7 + $0x1e0] ss:$16 sps:$4 sm:$0xff]   ;;  %p2037_p8 = pnand %p2036_p7, %p2030_p4 }
  0x6f   :  { %947 = vmatprep.subr.bf16.mxu0 %v1771_v28  ;;  %1702 = vmatmul.mubr.bf16.vlgmr.msra.gmra.mrb[0].mxu1 %v82_v26  ;;  %v1858_v26 = vld [vmem:[#allocation7 + $0x1ec] ss:$16 sps:$4 sm:$0xff]   ;;  %v1856_v28 = vld [vmem:[#allocation7 + $0x1e8] ss:$16 sps:$4 sm:$0xff]  }
  0x70   :  { %1028 = vmatpush1.bf16.msra.mxu1 %v1766_v36 }
  0x71   :  { %1029 = vmatprep.subr.bf16.mxu1 %v1774_v37 }
  0x72   :  { %948 = vmatpush1.bf16.msra.mxu0 %v1769_v30  ;;  %v1864_v30 = vld [vmem:[#allocation7 + $0x20c] ss:$16 sps:$4 sm:$0xff]  }
  0x73   :  { %949 = vmatprep.subr.bf16.mxu0 %v1777_v31  ;;  %v117_v31 = vlaneseq }
  0x74   :  { %1030 = vmatpush1.bf16.msra.mxu1 %v1772_v40 }
  0x75   :  { %1031 = vmatprep.subr.bf16.mxu1 %v1780_v41  ;;  %v2171_v32 = vshrl.u32 %v117_v31, 7  ;;  %v1915_v31 = vld [vmem:[#allocation8 + $0x50] sm:$0xff]  }
  0x76   :  { %950 = vmatpush1.bf16.msra.mxu0 %v1775_v34  ;;  %v115_v34 = vld [vmem:[%s2214_s2] sm:$0x7] }
  0x77   :  { %951 = vmatprep.subr.bf16.mxu0 %v1783_v35  ;;  %v119_v33 = vsub.s32 0, %v2171_v32  ;;  %v123_v35 = vsub.s32 1, %v2171_v32 }
  0x78   :  { %1032 = vmatpush1.bf16.msra.mxu1 %v1778_v44 }
  0x79   :  { %1033 = vmatprep.subr.bf16.mxu1 %v1786_v45  ;;  %v120_v36 = vrot.slane %v115_v34, %v119_v33  ;;  %v124_v37 = vrot.slane %v115_v34, %v123_v35 }
  0x7a   :  { %952 = vmatpush1.bf16.msra.mxu0 %v1781_v38 }
  0x7b   :  { %953 = vmatprep.subr.bf16.mxu0 %v1789_v39 }
  0x7c   :  { %1034 = vmatpush1.bf16.msra.mxu1 %v1784_v48  ;;  %v1862_v48 = vld [vmem:[#allocation7 + $0x208] ss:$16 sps:$4 sm:$0xff]  }
  0x7d   :  { %1035 = vmatprep.subr.bf16.mxu1 %v1792_v49 }
  0x7e   :  { %954 = vmatpush1.bf16.msra.mxu0 %v1787_v42 }
  0x7f   :  { %955 = vmatprep.subr.bf16.mxu0 %v1795_v43 }
  0x80   :  { %1036 = vmatpush1.bf16.msra.mxu1 %v1790_v50  ;;  %v1867_v50 = vld [vmem:[#allocation7 + $0x224] ss:$16 sps:$4 sm:$0xff]  }
  0x81   :  { %1037 = vmatprep.subr.bf16.mxu1 %v1798_v52  ;;  %v1865_v52 = vld [vmem:[#allocation7 + $0x220] ss:$16 sps:$4 sm:$0xff]  }
  0x82   :  { %956 = vmatpush1.bf16.msra.mxu0 %v1793_v46 }
  0x83   :  { %957 = vmatprep.subr.bf16.mxu0 %v1801_v47  ;;  %v1859_v47 = vld [vmem:[#allocation7 + $0x200] ss:$16 sps:$4 sm:$0xff]  }
  0x84   :  { %1038 = vmatpush1.bf16.msra.mxu1 %v1796_v56  ;;  %v1876_v56 = vld [vmem:[#allocation7 + $0x24c] ss:$16 sps:$4 sm:$0xff]  }
  0x85   :  { %1039 = vmatprep.subr.bf16.mxu1 %v1804_v57 }
  0x86   :  { %958 = vmatpush1.bf16.msra.mxu0 %v1799_v51  ;;  %v1870_v51 = vld [vmem:[#allocation7 + $0x22c] ss:$16 sps:$4 sm:$0xff]  }
  0x87   :  { %959 = vmatprep.subr.bf16.mxu0 %v1807_v53  ;;  %v1868_v53 = vld [vmem:[#allocation7 + $0x228] ss:$16 sps:$4 sm:$0xff]  }
  0x88   :  { %1040 = vmatpush1.bf16.msra.mxu1 %v1802_v60  ;;  %v1871_v60 = vld [vmem:[#allocation7 + $0x240] ss:$16 sps:$4 sm:$0xff]  }
  0x89   :  { %1041 = vmatprep.subr.bf16.mxu1 %v1810_v61  ;;  %v1874_v61 = vld [vmem:[#allocation7 + $0x248] ss:$16 sps:$4 sm:$0xff]  }
  0x8a   :  { %960 = vmatpush1.bf16.msra.mxu0 %v1805_v54 }
  0x8b   :  { %961 = vmatprep.subr.bf16.mxu0 %v1813_v55  ;;  %v1873_v55 = vld [vmem:[#allocation7 + $0x244] ss:$16 sps:$4 sm:$0xff]  }
  0x8c   :  { %1042 = vmatpush1.bf16.msra.mxu1 %v1808_v0  ;;  %v1877_v0 = vld [vmem:[#allocation7 + $0x260] ss:$16 sps:$4 sm:$0xff]  }
  0x8d   :  { %1043 = vmatprep.subr.bf16.mxu1 %v1816_v2  ;;  %v1880_v2 = vld [vmem:[#allocation7 + $0x268] ss:$16 sps:$4 sm:$0xff]  }
  0x8e   :  { %962 = vmatpush1.bf16.msra.mxu0 %v1811_v58 }
  0x8f   :  { %963 = vmatprep.subr.bf16.mxu0 %v1819_v59 }
  0x90   :  { %1044 = vmatpush1.bf16.msra.mxu1 %v1814_v5  ;;  %v127_v5 = vsub.s32 2, %v2171_v32 }
  0x91   :  { %1045 = vmatprep.subr.bf16.mxu1 %v1822_v6  ;;  %v1886_v6 = vld [vmem:[#allocation7 + $0x288] ss:$16 sps:$4 sm:$0xff]  }
  0x92   :  { %964 = vmatpush1.bf16.msra.mxu0 %v1817_v62  ;;  %v1879_v62 = vld [vmem:[#allocation7 + $0x264] ss:$16 sps:$4 sm:$0xff]  }
  0x93   :  { %965 = vmatprep.subr.bf16.mxu0 %v1825_v63  ;;  %v1882_v63 = vld [vmem:[#allocation7 + $0x26c] ss:$16 sps:$4 sm:$0xff]  }
  0x94   :  { %1046 = vmatpush1.bf16.msra.mxu1 %v1820_v9  ;;  %v128_v9 = vrot.slane %v115_v34, %v127_v5  ;;  %v1916_v34 = vld [vmem:[#allocation8 + $0xd0] sm:$0xff]  }
  0x95   :  { %1047 = vmatprep.subr.bf16.mxu1 %v1828_v10  ;;  %v1889_v10 = vld [vmem:[#allocation7 + $0x2a0] ss:$16 sps:$4 sm:$0xff]  }
  0x96   :  { %966 = vmatpush1.bf16.msra.mxu0 %v1823_v3  ;;  %v1885_v3 = vld [vmem:[#allocation7 + $0x284] ss:$16 sps:$4 sm:$0xff]  }
  0x97   :  { %967 = vmatprep.subr.bf16.mxu0 %v1831_v4  ;;  %v1888_v4 = vld [vmem:[#allocation7 + $0x28c] ss:$16 sps:$4 sm:$0xff]  }
  0x98   :  { %1048 = vmatpush1.bf16.msra.mxu1 %v1826_v13  ;;  %v1900_v13 = vld [vmem:[#allocation7 + $0x2cc] ss:$16 sps:$4 sm:$0xff]  }
  0x99   :  { %1049 = vmatprep.subr.bf16.mxu1 %v1834_v14 }
  0x9a   :  { %968 = vmatpush1.bf16.msra.mxu0 %v1829_v7  ;;  %v1891_v7 = vld [vmem:[#allocation7 + $0x2a4] ss:$16 sps:$4 sm:$0xff]  }
  0x9b   :  { %969 = vmatprep.subr.bf16.mxu0 %v1837_v8  ;;  %v1894_v8 = vld [vmem:[#allocation7 + $0x2ac] ss:$16 sps:$4 sm:$0xff]  }
  0x9c   :  { %1050 = vmatpush1.bf16.msra.mxu1 %v1832_v16  ;;  %v1898_v16 = vld [vmem:[#allocation7 + $0x2c8] ss:$16 sps:$4 sm:$0xff]  }
  0x9d   :  { %1051 = vmatprep.subr.bf16.mxu1 %v1840_v17  ;;  %v1903_v17 = vld [vmem:[#allocation7 + $0x2e4] ss:$16 sps:$4 sm:$0xff]  }
  0x9e   :  { %970 = vmatpush1.bf16.msra.mxu0 %v1835_v11  ;;  %v1892_v11 = vld [vmem:[#allocation7 + $0x2a8] ss:$16 sps:$4 sm:$0xff]  }
  0x9f   :  { %971 = vmatprep.subr.bf16.mxu0 %v1843_v12  ;;  %v1897_v12 = vld [vmem:[#allocation7 + $0x2c4] ss:$16 sps:$4 sm:$0xff]  }
  0xa0   :  { %1052 = vmatpush1.bf16.msra.mxu1 %v1838_v18  ;;  %v1906_v18 = vld [vmem:[#allocation7 + $0x2ec] ss:$16 sps:$4 sm:$0xff]  }
  0xa1   :  { %1053 = vmatprep.subr.bf16.mxu1 %v1846_v19 }
  0xa2   :  { %972 = vmatpush1.bf16.msra.mxu0 %v1841_v15  ;;  %v1895_v15 = vld [vmem:[#allocation7 + $0x2c0] ss:$16 sps:$4 sm:$0xff]  }
  0xa3   :  { %973 = vmatprep.subr.bf16.mxu0 %v1849_v21  ;;  %v1904_v21 = vld [vmem:[#allocation7 + $0x2e8] ss:$16 sps:$4 sm:$0xff]  }
  0xa4   :  { %1054 = vmatpush1.bf16.msra.mxu1 %v1844_v20  ;;  %v1901_v20 = vld [vmem:[#allocation7 + $0x2e0] ss:$16 sps:$4 sm:$0xff]  }
  0xa5   :  { %1055 = vmatprep.subr.bf16.mxu1 %v1852_v22  ;;  %v1907_v22 = vld [vmem:[#allocation8 + $0x40] sm:$0xff]  }
  0xa6   :  { %974 = vmatpush1.bf16.msra.mxu0 %v1847_v23  ;;  %v1908_v23 = vld [vmem:[#allocation8 + $0xc0] sm:$0xff]  }
  0xa7   :  { %975 = vmatprep.subr.bf16.mxu0 %v1855_v25  ;;  %v1909_v25 = vld [vmem:[#allocation8] sm:$0xff]  }
  0xa8   :  { %1056 = vmatpush1.bf16.msra.mxu1 %v1850_v24 }
  0xa9   :  { %1057 = vmatprep.subr.bf16.mxu1 %v1858_v26  ;;  %v1910_v26 = vld [vmem:[#allocation8 + $0x80] sm:$0xff]  }
  0xaa   :  { %976 = vmatpush1.bf16.msra.mxu0 %v1853_v27  ;;  %v1911_v27 = vld [vmem:[#allocation8 + $0x48] sm:$0xff]  }
  0xab   :  { %986 = vmatprep.subr.bf16.mxu0 %v1861_v29  ;;  %v1913_v29 = vld [vmem:[#allocation8 + $0x8] sm:$0xff]  }
  0xac   :  { %1058 = vmatpush1.bf16.msra.mxu1 %v1856_v28  ;;  %v1912_v28 = vld [vmem:[#allocation8 + $0xc8] sm:$0xff]  }
  0xad   :  { %1068 = vmatprep.subr.bf16.mxu1 %v1864_v30  ;;  %v1914_v30 = vld [vmem:[#allocation8 + $0x88] sm:$0xff]  }
 0x140   :  { %v294_v38 = vpop.f32.mrb[0].mxu0 }
 0x141   :  { %v295_v39 = vadd.f32 %v294_v38, %v120_v36  ;;  %v296_v40 = vpop.f32.mrb[1].mxu0  ;;  %v1917_v36 = vld [vmem:[#allocation8 + $0x10] sm:$0xff]   ;;  %v1919_v38 = vld [vmem:[#allocation8 + $0x58] sm:$0xff]  }
 0x142   :  { %v297_v41 = vadd.f32 %v296_v40, %v124_v37  ;;  %v298_v42 = vpop.f32.mrb[2].mxu0  ;;  %v335_v54 = vpop.f32.mrb[0].mxu1  ;;  %v1918_v37 = vld [vmem:[#allocation8 + $0x90] sm:$0xff]   ;;  %v1921_v40 = vld [vmem:[#allocation8 + $0x18] sm:$0xff]  }
 0x143   :  { %v341_v43 = vmax.f32 %v295_v39, 0.0  ;;  %v299_v44 = vpop.f32.mrb[3].mxu0  ;;  %v1703_v57 = vpop.f32.mrb[1].mxu1  ;;  %v336_v14 = vadd.f32 %v335_v54, %v128_v9  ;;  %v1920_v39 = vld [vmem:[#allocation8 + $0xd8] sm:$0xff]   ;;  %v1923_v42 = vld [vmem:[#allocation8 + $0x60] sm:$0xff]  }
 0x144   :  { %v342_v45 = vmax.f32 %v297_v41, 0.0  ;;  %v338_v58 = vpop.f32.mrb[2].mxu1  ;;  %v1922_v41 = vld [vmem:[#allocation8 + $0x98] sm:$0xff]   ;;  %v1925_v44 = vld [vmem:[#allocation8 + $0x20] sm:$0xff]  }
 0x145   :  { %v344_v49 = vpack.c.bf16 %v341_v43, %v341_v43  ;;  %v1704_v59 = vpop.f32.mrb[3].mxu1  ;;  %v343_v19 = vmax.f32 %v336_v14, 0.0  ;;  %v1924_v43 = vld [vmem:[#allocation8 + $0xe0] sm:$0xff]   ;;  %v1935_v54 = vld [vmem:[#allocation8 + $0x78] sm:$0xff]  }
 0x146   :  { %v345_v46 = vpack.c.bf16 %v342_v45, %v342_v45  ;;  %v1926_v45 = vld [vmem:[#allocation8 + $0xa0] sm:$0xff]   ;;  %v1938_v57 = vld [vmem:[#allocation8 + $0xb8] sm:$0xff]   ;;  %v459_v59 = vsub.s32 3, %v2171_v32 }
 0x147   :  { %v346_v24 = vpack.c.bf16 %v343_v19, %v343_v19  ;;  %v443_v58 = vld [vmem:[%s2216_s4] sm:$0xf] }
 0x148   :  { %977 = vmatprep.mubr.bf16.mxu0 %v345_v46  ;;  %1059 = vmatprep.mubr.bf16.mxu1 %v345_v46  ;;  %v1927_v46 = vld [vmem:[#allocation8 + $0x68] sm:$0xff]   ;;  %v1599_v19 = vld [vmem:[%s2218_s6] ss:$0 sm:$0xff] }
 0x149   :  { %978 = vmatmul.mubr.bf16.vlgmr.msra.gmra.mrb[4].mxu0 %v344_v49  ;;  %1060 = vmatmul.mubr.bf16.vlgmr.msra.gmra.mrb[4].mxu1 %v344_v49  ;;  %v1930_v49 = vld [vmem:[#allocation8 + $0xa8] sm:$0xff]  }
 0x14a   :  { %987 = vmatpush1.bf16.msra.mxu0 %v1859_v47  ;;  %1069 = vmatpush1.bf16.msra.mxu1 %v1862_v48  ;;  %v1928_v47 = vld [vmem:[#allocation8 + $0xe8] sm:$0xff]  }
 0x14b   :  { %988 = vmatprep.subr.bf16.mxu0 %v1867_v50  ;;  %1070 = vmatprep.subr.bf16.mxu1 %v1870_v51  ;;  %v1929_v48 = vld [vmem:[#allocation8 + $0x28] sm:$0xff]   ;;  %v1931_v50 = vld [vmem:[#allocation8 + $0x70] sm:$0xff]  }
 0x14c   :  { %1018 = vmatprep.mubr.bf16.mxu0 %v2070_v1  ;;  %1100 = vmatprep.mubr.bf16.mxu1 %v2070_v1  ;;  %v1883_v1 = vld [vmem:[#allocation7 + $0x280] ss:$16 sps:$4 sm:$0xff]  }
 0x14d   :  { %v1932_v51 = vld [vmem:[#allocation8 + $0xf0] sm:$0xff]  }
 0x14e   :  { %989 = vmatpush1.bf16.msra.mxu0 %v1865_v52  ;;  %1071 = vmatpush1.bf16.msra.mxu1 %v1868_v53  ;;  %v1933_v52 = vld [vmem:[#allocation8 + $0x30] sm:$0xff]  }
 0x14f   :  { %990 = vmatprep.subr.bf16.mxu0 %v1873_v55  ;;  %1072 = vmatprep.subr.bf16.mxu1 %v1876_v56  ;;  %v1934_v53 = vld [vmem:[#allocation8 + $0xb0] sm:$0xff]   ;;  %v1936_v55 = vld [vmem:[#allocation8 + $0xf8] sm:$0xff]  }
 0x150   :  { %v1937_v56 = vld [vmem:[#allocation8 + $0x38] sm:$0xff]  }
 0x152   :  { %991 = vmatpush1.bf16.msra.mxu0 %v1871_v60  ;;  %1073 = vmatpush1.bf16.msra.mxu1 %v1874_v61  ;;  %v448_v60 = vrot.slane %v443_v58, %v119_v33  ;;  %v456_v61 = vrot.slane %v443_v58, %v127_v5 }
 0x153   :  { %992 = vmatprep.subr.bf16.mxu0 %v1879_v62  ;;  %1074 = vmatprep.subr.bf16.mxu1 %v1882_v63  ;;  %v452_v62 = vrot.slane %v443_v58, %v123_v35  ;;  %v460_v63 = vrot.slane %v443_v58, %v459_v59 }
 0x156   :  { %993 = vmatpush1.bf16.msra.mxu0 %v1877_v0  ;;  %1075 = vmatpush1.bf16.msra.mxu1 %v1880_v2 }
 0x157   :  { %994 = vmatprep.subr.bf16.mxu0 %v1885_v3  ;;  %1076 = vmatprep.subr.bf16.mxu1 %v1888_v4 }
 0x15a   :  { %995 = vmatpush1.bf16.msra.mxu0 %v1883_v1  ;;  %1077 = vmatpush1.bf16.msra.mxu1 %v1886_v6 }
 0x15b   :  { %996 = vmatprep.subr.bf16.mxu0 %v1891_v7  ;;  %1078 = vmatprep.subr.bf16.mxu1 %v1894_v8 }
 0x15e   :  { %997 = vmatpush1.bf16.msra.mxu0 %v1889_v10  ;;  %1079 = vmatpush1.bf16.msra.mxu1 %v1892_v11 }
 0x15f   :  { %998 = vmatprep.subr.bf16.mxu0 %v1897_v12  ;;  %1080 = vmatprep.subr.bf16.mxu1 %v1900_v13 }
 0x162   :  { %999 = vmatpush1.bf16.msra.mxu0 %v1895_v15  ;;  %1081 = vmatpush1.bf16.msra.mxu1 %v1898_v16 }
 0x163   :  { %1000 = vmatprep.subr.bf16.mxu0 %v1903_v17  ;;  %1082 = vmatprep.subr.bf16.mxu1 %v1906_v18 }
 0x166   :  { %1001 = vmatpush1.bf16.msra.mxu0 %v1901_v20  ;;  %1083 = vmatpush1.bf16.msra.mxu1 %v1904_v21 }
 0x167   :  { %1641 = vmatprep.subr.bf16.mxu0 %v1907_v22  ;;  %1663 = vmatprep.subr.bf16.mxu1 %v1908_v23 }
 0x169   :  { %1019 = vmatmul.mubr.bf16.vlgmr.msra.gmra.mrb[4].mxu0 %v346_v24  ;;  %1101 = vmatmul.mubr.bf16.vlgmr.msra.gmra.mrb[4].mxu1 %v346_v24 }
 0x16a   :  { %1642 = vmatpush3.bf16.msra.mxu0 %v1909_v25  ;;  %1664 = vmatpush3.bf16.msra.mxu1 %v1910_v26 }
 0x16b   :  { %1643 = vmatprep.subr.bf16.mxu0 %v1911_v27  ;;  %1665 = vmatprep.subr.bf16.mxu1 %v1912_v28 }
 0x16e   :  { %1644 = vmatpush3.bf16.msra.mxu0 %v1913_v29  ;;  %1666 = vmatpush3.bf16.msra.mxu1 %v1914_v30 }
 0x16f   :  { %1645 = vmatprep.subr.bf16.mxu0 %v1915_v31  ;;  %1667 = vmatprep.subr.bf16.mxu1 %v1916_v34 }
 0x172   :  { %1646 = vmatpush3.bf16.msra.mxu0 %v1917_v36  ;;  %1668 = vmatpush3.bf16.msra.mxu1 %v1918_v37 }
 0x173   :  { %1647 = vmatprep.subr.bf16.mxu0 %v1919_v38  ;;  %1669 = vmatprep.subr.bf16.mxu1 %v1920_v39 }
 0x176   :  { %1648 = vmatpush3.bf16.msra.mxu0 %v1921_v40  ;;  %1670 = vmatpush3.bf16.msra.mxu1 %v1922_v41 }
 0x177   :  { %1649 = vmatprep.subr.bf16.mxu0 %v1923_v42  ;;  %1671 = vmatprep.subr.bf16.mxu1 %v1924_v43 }
 0x17a   :  { %1650 = vmatpush3.bf16.msra.mxu0 %v1925_v44  ;;  %1672 = vmatpush3.bf16.msra.mxu1 %v1926_v45 }
 0x17b   :  { %1651 = vmatprep.subr.bf16.mxu0 %v1927_v46  ;;  %1673 = vmatprep.subr.bf16.mxu1 %v1928_v47 }
 0x17e   :  { %1652 = vmatpush3.bf16.msra.mxu0 %v1929_v48  ;;  %1674 = vmatpush3.bf16.msra.mxu1 %v1930_v49 }
 0x17f   :  { %1653 = vmatprep.subr.bf16.mxu0 %v1931_v50  ;;  %1675 = vmatprep.subr.bf16.mxu1 %v1932_v51 }
 0x182   :  { %1654 = vmatpush3.bf16.msra.mxu0 %v1933_v52  ;;  %1676 = vmatpush3.bf16.msra.mxu1 %v1934_v53 }
 0x183   :  { %1655 = vmatprep.subr.bf16.mxu0 %v1935_v54  ;;  %1677 = vmatprep.subr.bf16.mxu1 %v1936_v55 }
 0x186   :  { %1656 = vmatpush3.bf16.msra.mxu0 %v1937_v56  ;;  %1678 = vmatpush3.bf16.msra.mxu1 %v1938_v57 }
 0x23c   :  { %v1020_v0 = vpop.f32.mrb[4].mxu0  ;;  %v1102_v2 = vpop.f32.mrb[4].mxu1 }
 0x23d   :  { %v1705_v3 = vadd.f32 %v1020_v0, %v448_v60  ;;  %v1707_v4 = vadd.f32 %v1102_v2, %v456_v61  ;;  %v1022_v1 = vpop.f32.mrb[5].mxu0  ;;  %v1104_v6 = vpop.f32.mrb[5].mxu1 }
 0x23e   :  { %v1706_v7 = vadd.f32 %v1022_v1, %v452_v62  ;;  %v1708_v8 = vadd.f32 %v1104_v6, %v460_v63  ;;  %v1024_v9 = vpop.f32.mrb[6].mxu0  ;;  %v1106_v10 = vpop.f32.mrb[6].mxu1 }
 0x23f   :  { %v1109_v11 = vmax.f32 %v1705_v3, 0.0  ;;  %v1111_v12 = vmax.f32 %v1707_v4, 0.0  ;;  %v1025_v33 = vpop.f32.mrb[7].mxu0  ;;  %v1107_v13 = vpop.f32.mrb[7].mxu1 }
 0x240   :  { %v1110_v14 = vmax.f32 %v1706_v7, 0.0  ;;  %v1112_v5 = vmax.f32 %v1708_v8, 0.0 }
 0x241   :  { %v1113_v35 = vpack.c.bf16 %v1109_v11, %v1109_v11  ;;  %v1115_v16 = vpack.c.bf16 %v1111_v12, %v1111_v12 }
 0x242   :  { %v1114_v15 = vpack.c.bf16 %v1110_v14, %v1110_v14  ;;  %v1116_v32 = vpack.c.bf16 %v1112_v5, %v1112_v5 }
 0x244   :  { %1412 = vmatprep.mubr.bf16.mxu0 %v1114_v15  ;;  %1452 = vmatprep.mubr.bf16.mxu1 %v1116_v32 }
 0x245   :  { %1413 = vmatmul.mubr.bf16.vlgmr.msra.gmra.mrb[8].mxu0 %v1113_v35  ;;  %1453 = vmatmul.mubr.bf16.vlgmr.msra.gmra.mrb[8].mxu1 %v1115_v16 }
 0x318   :  { %v1657_v17 = vpop.f32.mrb[8].mxu0  ;;  %v1679_v18 = vpop.f32.mrb[8].mxu1 }
 0x319   :  { %v1658_v20 = vpop.f32.mrb[9].mxu0  ;;  %v1680_v21 = vpop.f32.mrb[9].mxu1 }
 0x31a   :  { %v1659_v22 = vadd.f32 %v1658_v20, %v1657_v17  ;;  %v1681_v23 = vadd.f32 %v1680_v21, %v1679_v18  ;;  %v1660_v24 = vpop.f32.mrb[10].mxu0  ;;  %v1682_v25 = vpop.f32.mrb[10].mxu1 }
 0x31b   :  { %v1661_v26 = vpop.f32.mrb[11].mxu0  ;;  %v1683_v27 = vpop.f32.mrb[11].mxu1 }
 0x31c   :  { %v1415_v28 = vadd.f32 %v1659_v22, %v1599_v19 }
 0x31e   :  { %v1455_v29 = vadd.f32 %v1681_v23, %v1415_v28 }
 0x320   :  { %1939 = vtanh.f32 %v1455_v29 }
 0x32a   :  { %v1940_v30 = vpop.eup %1939 }
 0x32b   :  { %1461 = vst [vmem:[#allocation10] sm:$0xff] %v1940_v30 }
 0x32c   :  { %2040 = shalt.err (!%p2037_p8)
}
 0x32d   :  { %s2041_s12 = scalar_lea.hbm %s2219_s7, 128 }
 0x32e   :  { %p2042_p9 = scmp.ne.s32.totalorder %s2219_s7, %s2041_s12  ;;  %p2045_p10 = scmp.lt.u32.totalorder %s2041_s12, %s2219_s7 }
 0x330   :  { %p2047_p11 = pnand %p2045_p10, %p2042_p9 }
 0x332   :  { %2050 = shalt.err (!%p2047_p11)
}
 0x333   :  { %1471 = dma.vmem_to_hbm [thread:$0]  %s1469_s9, 128, %s2219_s7, [#allocation4]  }
 0x334   :  { %2057 = dma.done.wait [#allocation4], 128  }
 0x335   :  { %2058 = vsyncadd [#allocation4], 4294967168 }
 0x336   :  { %1475 = vsyncpa [#allocation3], 1 }
 0x337   :  { %1476 = vsyncpa [#allocation6], 1 }
 0x338   :  { %1477 = vsyncpa [#allocation9], 1 }
 0x339   :  { %1478 = vsyncpa [#allocation4], 1 }

</bundles_post_ra>
